<compile_context>
chip_gen: v7x
topology: tpu7x:2x2x1
jax: 0.10.0
libtpu: 0.0.40
codegen_flags: <defaults>
</compile_context>

<pallas_src>
import math
import random
from functools import partial

import numpy as np
import jax
import jax.numpy as jnp
from jax.experimental import pallas as pl
from jax.experimental.pallas import tpu as pltpu


# ---------------------------------------------------------------------------
# torchaudio-equivalent sinc resample kernel construction (host-side numpy).
# Matches torchaudio.functional._get_sinc_resample_kernel with
# lowpass_filter_width=6, rolloff=0.99, resampling_method="sinc_interp_hann".
# ---------------------------------------------------------------------------
def _make_sinc_resample_kernel(orig_freq: int, new_freq: int,
                               lowpass_filter_width: int = 6,
                               rolloff: float = 0.99):
    base_freq = min(orig_freq, new_freq) * rolloff
    width = int(math.ceil(lowpass_filter_width * orig_freq / base_freq))
    idx = np.arange(-width, width + orig_freq, dtype=np.float64) / orig_freq  # (K,)
    t = np.arange(0, -new_freq, -1, dtype=np.float64)[:, None] / new_freq + idx[None, :]
    t = t * base_freq
    t = np.clip(t, -lowpass_filter_width, lowpass_filter_width)
    window = np.cos(t * math.pi / lowpass_filter_width / 2.0) ** 2
    t = t * math.pi
    scale = base_freq / orig_freq
    safe_t = np.where(t == 0.0, 1.0, t)
    kernels = np.where(t == 0.0, 1.0, np.sin(safe_t) / safe_t)
    kernels = kernels * window * scale
    return kernels.astype(np.float32), width          # (new_freq, K), width


def _make_polyphase_kernel(orig_freq: int, new_freq: int, **kw):
    """(new_freq, K) sinc taps -> (n_chunks, new_freq, orig_freq) polyphase taps."""
    kern2d, width = _make_sinc_resample_kernel(orig_freq, new_freq, **kw)
    K = kern2d.shape[1]
    n_chunks = -(-K // orig_freq)                     # ceil(K / orig_freq)
    k_pad = n_chunks * orig_freq
    kp = np.zeros((new_freq, k_pad), np.float32)
    kp[:, :K] = kern2d
    kern3 = np.ascontiguousarray(
        kp.reshape(new_freq, n_chunks, orig_freq).transpose(1, 0, 2))
    return jnp.asarray(kern3), width                  # (n_chunks, new_freq, orig_freq)


# ---------------------------------------------------------------------------
# Pallas kernel: one tile of `tile_frames` output frames.
#   win_ref : (1, orig_freq, tile_frames + n_chunks - 1) f32  phase-decomposed wave
#   kern_ref: (n_chunks, new_freq, orig_freq)            f32  resident sinc taps
#   out_ref : (1, new_freq, tile_frames)                 f32  lane-dense output
# out[j, f] = sum_c sum_r kern[c, j, r] * win[r, f + c]
# ---------------------------------------------------------------------------
def _resample_tile_kernel(win_ref, kern_ref, out_ref, *, n_chunks, tile_frames):
    y = win_ref[0]                                         # (orig_freq, R)
    acc = jnp.dot(kern_ref[0], y[:, 0:tile_frames],
                  preferred_element_type=jnp.float32)      # (new_freq, tile_frames)
    for c in range(1, n_chunks):                           # static unroll, n_chunks ~ 2..8
        acc = acc + jnp.dot(kern_ref[c], y[:, c:c + tile_frames],
                            preferred_element_type=jnp.float32)
    out_ref[0] = acc


def _pallas_resample_tiles(windows: jnp.ndarray, kern3: jnp.ndarray,
                           new_freq: int, tile_frames: int) -> jnp.ndarray:
    num_blocks, orig_freq, R = windows.shape
    n_chunks = kern3.shape[0]

    flops = 2 * num_blocks * new_freq * tile_frames * n_chunks * orig_freq
    out_bytes = num_blocks * new_freq * tile_frames * 4
    bytes_accessed = windows.size * 4 + kern3.size * 4 + out_bytes

    kernel = partial(_resample_tile_kernel, n_chunks=n_chunks, tile_frames=tile_frames)
    return pl.pallas_call(
        kernel,
        out_shape=jax.ShapeDtypeStruct((num_blocks, new_freq, tile_frames), jnp.float32),
        grid=(num_blocks,),
        in_specs=[
            pl.BlockSpec((1, orig_freq, R), lambda i: (i, 0, 0)),
            pl.BlockSpec((n_chunks, new_freq, orig_freq), lambda i: (0, 0, 0)),
        ],
        out_specs=pl.BlockSpec((1, new_freq, tile_frames), lambda i: (i, 0, 0)),
        compiler_params=pltpu.CompilerParams(
            dimension_semantics=("parallel",),
            vmem_limit_bytes=32 * 1024 * 1024,
        ),
        cost_estimate=pl.CostEstimate(
            flops=flops, transcendentals=0, bytes_accessed=bytes_accessed),
    )(windows, kern3)


# ---------------------------------------------------------------------------
# torchaudio.functional._apply_sinc_resample_kernel equivalent.
#   wave: (B, T) f32 -> (B, ceil(new_freq * T / orig_freq)) f32
# ---------------------------------------------------------------------------
def _speed_resample(wave: jnp.ndarray, kern3: jnp.ndarray, width: int,
                    orig_freq: int, new_freq: int, tile_frames: int = 512) -> jnp.ndarray:
    B, T = wave.shape
    n_chunks = kern3.shape[0]

    num_frames = T // orig_freq + 1                      # torchaudio frame count
    num_tiles = int(pl.cdiv(num_frames, tile_frames))
    F_pad = num_tiles * tile_frames
    # TODO(synk): bucket T / num_tiles to a small fixed set in a real pipeline to
    # avoid one Mosaic recompile per distinct audio length.
    M_total = F_pad + tile_frames                        # one spare tile keeps halo slicing static
    L_req = M_total * orig_freq

    # torchaudio left-pad by `width`; right zero-pad up to the tiled length.
    padded = jnp.pad(wave.astype(jnp.float32), ((0, 0), (width, L_req - width - T)))

    # Phase decomposition: chunk[b, m, r] = padded[b, m*orig_freq + r]  (pure reshape)
    chunks = padded.reshape(B, M_total, orig_freq)
    main = chunks[:, :F_pad].reshape(B, num_tiles, tile_frames, orig_freq)
    halo = chunks[:, tile_frames:tile_frames + F_pad]
    halo = halo.reshape(B, num_tiles, tile_frames, orig_freq)[:, :, :n_chunks - 1]
    win = jnp.concatenate([main, halo], axis=2)          # (B, nt, R, orig_freq)
    R = tile_frames + n_chunks - 1
    # frames on lanes, phase on sublanes -> lane-dense VMEM blocks
    win = win.transpose(0, 1, 3, 2).reshape(B * num_tiles, orig_freq, R)

    out = _pallas_resample_tiles(win, kern3, new_freq, tile_frames)   # (B*nt, nf, tf)
    out = out.reshape(B, num_tiles, new_freq, tile_frames).transpose(0, 1, 3, 2)
    out = out.reshape(B, F_pad * new_freq)

    target_len = int(math.ceil(new_freq * T / orig_freq))
    return out[:, :target_len]


# ---------------------------------------------------------------------------
# RandomSpeedChange module equivalent.
# ---------------------------------------------------------------------------
class RandomSpeedChange:
    def __init__(self, sr: int, speed_factor=(1.4,), p: float = 0.5, seed: int = 0,
                 tile_frames: int = 512):
        self.sr = sr
        self.p = p
        self.tile_frames = tile_frames
        self._rng = random.Random(seed)                  # deterministic host-side randomness
        self._stretcher_pool = []
        for k in speed_factor:
            # round() (not int()) so float error in k*sr can't shift the reduced ratio.
            source_sr = int(round(k * sr))
            target_sr = int(sr)
            g = math.gcd(source_sr, target_sr)
            orig_freq = source_sr // g
            new_freq = target_sr // g
            if orig_freq == new_freq:
                self._stretcher_pool.append((orig_freq, new_freq, None, 0))
            else:
                kern3, width = _make_polyphase_kernel(orig_freq, new_freq)
                self._stretcher_pool.append((orig_freq, new_freq, kern3, width))

    def __call__(self, wave: jnp.ndarray) -> jnp.ndarray:
        # TODO(synk): host-side Bernoulli/choice mirrors the PyTorch module's
        # random.random()/random.choice; it cannot live inside the TPU kernel.
        if self._rng.random() < self.p:
            orig_freq, new_freq, kern3, width = self._rng.choice(self._stretcher_pool)
            if orig_freq == new_freq:
                return wave
            return _speed_resample(wave, kern3, width, orig_freq, new_freq,
                                   tile_frames=self.tile_frames)
        return wave


if __name__ == "__main__":
    key = jax.random.PRNGKey(0)
    B, T = 2, 2048
    wave = jax.random.normal(key, (B, T), dtype=jnp.float32)

    # p=1.0 so the Pallas resample path is always exercised in this demo.
    aug = RandomSpeedChange(sr=16000, speed_factor=[1.4], p=1.0, seed=0)
    out = jax.block_until_ready(aug(wave))

    # Speed factor 1.4 with sr=16000 -> reduced resample ratio 7 -> 5.
    orig_freq, new_freq = 7, 5
    expected_len = int(math.ceil(new_freq * T / orig_freq))
    assert out.shape == (B, expected_len), (out.shape, (B, expected_len))
    assert bool(jnp.all(jnp.isfinite(out)))

    # Numerical sanity check vs a direct XLA im2col reference.
    kern2d, width = _make_sinc_resample_kernel(orig_freq, new_freq)
    K = kern2d.shape[1]
    padded = jnp.pad(wave, ((0, 0), (width, width + orig_freq)))
    num_frames = T // orig_freq + 1
    idx = np.arange(num_frames)[:, None] * orig_freq + np.arange(K)[None, :]
    frames = padded[:, idx]                                     # (B, F, K)
    ref = jnp.einsum("bfk,jk->bfj", frames, jnp.asarray(kern2d))
    ref = ref.reshape(B, num_frames * new_freq)[:, :expected_len]
    max_err = float(jnp.max(jnp.abs(out - ref)))
    assert max_err < 5e-2, max_err

    print("KERNEL_OK")
</pallas_src>

<mosaic_0001>
module attributes {stable_mosaic.version = 11 : i64} {
  func.func @_resample_tile_kernel(%arg0: i32, %arg1: memref<1x7x515xf32, #tpu.memory_space<vmem>>, %arg2: memref<4x5x7xf32, #tpu.memory_space<vmem>>, %arg3: memref<1x5x512xf32, #tpu.memory_space<vmem>>) attributes {dimension_semantics = [#tpu.dimension_semantics<parallel>], iteration_bounds = array<i64: 2>, scalar_prefetch = 0 : i64, scratch_operands = 0 : i64, tpu.core_type = #tpu.core_type<tc>, window_params = [{transform_indices = @transform_0, window_bounds = array<i64: 1, 7, 515>}, {pipeline_mode = #tpu.pipeline_mode<synchronous>, transform_indices = @transform_1, window_bounds = array<i64: 4, 5, 7>}, {transform_indices = @transform_2, window_bounds = array<i64: 1, 5, 512>}]} {
    %c0 = arith.constant 0 : index
    %c0_0 = arith.constant 0 : index
    %c0_1 = arith.constant 0 : index
    %0 = vector.load %arg1[%c0, %c0_0, %c0_1] : memref<1x7x515xf32, #tpu.memory_space<vmem>>, vector<1x7x515xf32>
    %1 = vector.shape_cast %0 : vector<1x7x515xf32> to vector<7x515xf32>
    %c0_2 = arith.constant 0 : index
    %c0_3 = arith.constant 0 : index
    %c0_4 = arith.constant 0 : index
    %2 = vector.load %arg2[%c0_2, %c0_3, %c0_4] : memref<4x5x7xf32, #tpu.memory_space<vmem>>, vector<1x5x7xf32>
    %3 = vector.shape_cast %2 : vector<1x5x7xf32> to vector<5x7xf32>
    %4 = vector.extract_strided_slice %1 {offsets = [0, 0], sizes = [7, 512], strides = [1, 1]} : vector<7x515xf32> to vector<7x512xf32>
    %cst = arith.constant dense<0.000000e+00> : vector<5x512xf32>
    %5 = tpu.matmul %3, %4, %cst {dimension_numbers = #tpu.dot_dimension_numbers<[1], [0], [0], [1], [0, 0, 1, 1], [], []>} : vector<5x7xf32>, vector<7x512xf32>, vector<5x512xf32> -> vector<5x512xf32>
    %c1 = arith.constant 1 : index
    %c0_5 = arith.constant 0 : index
    %c0_6 = arith.constant 0 : index
    %6 = vector.load %arg2[%c1, %c0_5, %c0_6] : memref<4x5x7xf32, #tpu.memory_space<vmem>>, vector<1x5x7xf32>
    %7 = vector.shape_cast %6 : vector<1x5x7xf32> to vector<5x7xf32>
    %8 = vector.extract_strided_slice %1 {offsets = [0, 1], sizes = [7, 512], strides = [1, 1]} : vector<7x515xf32> to vector<7x512xf32>
    %cst_7 = arith.constant dense<0.000000e+00> : vector<5x512xf32>
    %9 = tpu.matmul %7, %8, %cst_7 {dimension_numbers = #tpu.dot_dimension_numbers<[1], [0], [0], [1], [0, 0, 1, 1], [], []>} : vector<5x7xf32>, vector<7x512xf32>, vector<5x512xf32> -> vector<5x512xf32>
    %10 = arith.addf %5, %9 : vector<5x512xf32>
    %c2 = arith.constant 2 : index
    %c0_8 = arith.constant 0 : index
    %c0_9 = arith.constant 0 : index
    %11 = vector.load %arg2[%c2, %c0_8, %c0_9] : memref<4x5x7xf32, #tpu.memory_space<vmem>>, vector<1x5x7xf32>
    %12 = vector.shape_cast %11 : vector<1x5x7xf32> to vector<5x7xf32>
    %13 = vector.extract_strided_slice %1 {offsets = [0, 2], sizes = [7, 512], strides = [1, 1]} : vector<7x515xf32> to vector<7x512xf32>
    %cst_10 = arith.constant dense<0.000000e+00> : vector<5x512xf32>
    %14 = tpu.matmul %12, %13, %cst_10 {dimension_numbers = #tpu.dot_dimension_numbers<[1], [0], [0], [1], [0, 0, 1, 1], [], []>} : vector<5x7xf32>, vector<7x512xf32>, vector<5x512xf32> -> vector<5x512xf32>
    %15 = arith.addf %10, %14 : vector<5x512xf32>
    %c3 = arith.constant 3 : index
    %c0_11 = arith.constant 0 : index
    %c0_12 = arith.constant 0 : index
    %16 = vector.load %arg2[%c3, %c0_11, %c0_12] : memref<4x5x7xf32, #tpu.memory_space<vmem>>, vector<1x5x7xf32>
    %17 = vector.shape_cast %16 : vector<1x5x7xf32> to vector<5x7xf32>
    %18 = vector.extract_strided_slice %1 {offsets = [0, 3], sizes = [7, 512], strides = [1, 1]} : vector<7x515xf32> to vector<7x512xf32>
    %cst_13 = arith.constant dense<0.000000e+00> : vector<5x512xf32>
    %19 = tpu.matmul %17, %18, %cst_13 {dimension_numbers = #tpu.dot_dimension_numbers<[1], [0], [0], [1], [0, 0, 1, 1], [], []>} : vector<5x7xf32>, vector<7x512xf32>, vector<5x512xf32> -> vector<5x512xf32>
    %20 = arith.addf %15, %19 : vector<5x512xf32>
    %c0_14 = arith.constant 0 : index
    %c0_15 = arith.constant 0 : index
    %c0_16 = arith.constant 0 : index
    %21 = vector.load %arg3[%c0_14, %c0_15, %c0_16] : memref<1x5x512xf32, #tpu.memory_space<vmem>>, vector<1x5x512xf32>
    %22 = vector.shape_cast %21 : vector<1x5x512xf32> to vector<5x512xf32>
    %23 = vector.shape_cast %20 : vector<5x512xf32> to vector<1x5x512xf32>
    tpu.vector_store %arg3[%c0_14, %c0_15, %c0_16], %23 {strides = array<i32>} : memref<1x5x512xf32, #tpu.memory_space<vmem>>, vector<1x5x512xf32>,
    return
  }
  func.func @transform_0(%arg0: i32) -> (i32, i32, i32) {
    %c0_i32 = arith.constant 0 : i32
    %c0_i32_0 = arith.constant 0 : i32
    %c0_i32_1 = arith.constant 0 : i32
    return %arg0, %c0_i32, %c0_i32_0 : i32, i32, i32
  }
  func.func @transform_1(%arg0: i32) -> (i32, i32, i32) {
    %c0_i32 = arith.constant 0 : i32
    %c0_i32_0 = arith.constant 0 : i32
    %c0_i32_1 = arith.constant 0 : i32
    %c0_i32_2 = arith.constant 0 : i32
    return %c0_i32, %c0_i32_0, %c0_i32_1 : i32, i32, i32
  }
  func.func @transform_2(%arg0: i32) -> (i32, i32, i32) {
    %c0_i32 = arith.constant 0 : i32
    %c0_i32_0 = arith.constant 0 : i32
    %c0_i32_1 = arith.constant 0 : i32
    return %arg0, %c0_i32, %c0_i32_0 : i32, i32, i32
  }
}

</mosaic_0001>

<bundles_post_ra>
// kernel: tpu_custom_call.1
= control target key start
LH: loop header
LB: loop body
LE: loop exit
PB: predicated region body
PF: predicated region fallthrough
CT: control target
= control target key end

     0   :  { %s977_s9 = smov 0   ;;  %s1050_s0 = inlined_call_operand.vmem [shape: f32[2,7,515], index: 0, kind: input, shape index: {}]   ;;  %s1051_s1 = inlined_call_operand.vmem [shape: f32[4,5,7], index: 1, kind: input, shape index: {}]   ;;  %s1052_s2 = inlined_call_operand.vmem [shape: f32[2,5,512], index: 2, kind: output, shape index: {}]  }
   0x1 LB: > { %s887_s10 = sadd.s32 4294967295, %s956_s9   ;;  %p891_p0 = scmp.ge.s32.totalorder %s956_s9, 1  ;;  %s956_s9 = sphi %s977_s9, %s12_s9  }
   0x2   : > { %p112_p1 = scmp.lt.s32.totalorder %s956_s9, 3 }
   0x4   : > { %p113_p2 = pnand %p891_p0, %p112_p1 }
   0x5   : > { %p134_p3 = scmp.lt.s32.totalorder (!%p113_p2), %s887_s10, 1  ;;  %v958_v0 = vmov (!%p113_p2), 0.0   ;;  %s959_s15 = smov (!%p113_p2), 127   ;;  %vm167_vm0 = vcmask (!%p113_p2), 1039360   ;;  %vm176_vm1 = vcmask (!%p113_p2), 1046528   ;;  %vm172_vm2 = vcmask (!%p113_p2), 56320  }
   0x6   : > { %116 = sbr.rel (%p113_p2) target bundleno = 381 (0x17d), region = 28  ;;  %320 = vmatprep.mubr.f32.mxu1 (!%p113_p2), %v958_v0  ;;  %249 = vmatprep.mubr.f32.mxu0 (!%p113_p2), %v958_v0  ;;  %s960_s16 = smov (!%p113_p2), 126   ;;  %v895_v13 = vld [vmem:[%s1051_s1 + $0x8] sm:$0x1f] (!%p113_p2)  ;;  %vm492_vm3 = vcmask (!%p113_p2), 1031168   ;;  %vm666_vm4 = vcmask (!%p113_p2), 1022976  }
   0x7   : > { %s961_s17 = smov (!%p113_p2), 125   ;;  %v149_v20 = vld [vmem:[%s1051_s1] sm:$0x1f] (!%p113_p2)  ;;  %v908_v29 = vld [vmem:[%s1051_s1 + $0x10] sm:$0x1f] (!%p113_p2) }
   0x8   : > { %v915_v36 = vld [vmem:[%s1051_s1 + $0x18] sm:$0x1f] (!%p113_p2) }
   0xd   : > { %s1054_s10 = smov (!%p134_p3, %s887_s10), 1 }
   0xe   : > { %s937_s11 = smul.u32 40, %s1054_s10  ;;  %s924_s26 = sshll.u32 %s1054_s10, 5 }
   0xf   : > { %s143_s29 = scalar_lea.vmem %s1052_s2, %s924_s26 }
  0x10   : > { %s138_s14 = scalar_lea.vmem %s1050_s0, %s937_s11 }
  0x11   : > { %v147_v1 = vld [vmem:[%s138_s14 + $0x18] sm:$0x7f]  ;;  %v145_v2 = vld [vmem:[%s138_s14 + $0x8] sm:$0x7f]  ;;  %v148_v3 = vld [vmem:[%s138_s14 + $0x20] sm:$0x7f] }
  0x12   : > { %163 = vrot.lane.b32.xlu1 %v147_v1, %s959_s15  ;;  %159 = vrot.lane.b32.xlu0 %v145_v2, %s959_s15  ;;  %v146_v4 = vld [vmem:[%s138_s14 + $0x10] sm:$0x7f]  ;;  %v144_v5 = vld [vmem:[%s138_s14] sm:$0x7f] }
  0x16   : > { %165 = vrot.lane.b32.xlu1 %v148_v3, %s959_s15  ;;  %161 = vrot.lane.b32.xlu0 %v146_v4, %s959_s15 }
  0x1a   : > { %484 = vrot.lane.b32.xlu1 %v145_v2, %s960_s16  ;;  %157 = vrot.lane.b32.xlu0 %v144_v5, %s959_s15 }
  0x1e   : > { %488 = vrot.lane.b32.xlu1 %v147_v1, %s960_s16  ;;  %486 = vrot.lane.b32.xlu0 %v146_v4, %s960_s16 }
  0x22   : > { %482 = vrot.lane.b32.xlu1 %v144_v5, %s960_s16  ;;  %490 = vrot.lane.b32.xlu0 %v148_v3, %s960_s16 }
  0x26   : > { %660 = vrot.lane.b32.xlu1 %v146_v4, %s961_s17  ;;  %658 = vrot.lane.b32.xlu0 %v145_v2, %s961_s17 }
  0x2a   : > { %664 = vrot.lane.b32.xlu1 %v148_v3, %s961_s17  ;;  %662 = vrot.lane.b32.xlu0 %v147_v1, %s961_s17 }
  0x2e   : > { %656 = vrot.lane.b32.xlu0 %v144_v5, %s961_s17 }
  0x84   : > { %v164_v6 = vpop.permute.xlu1 %163  ;;  %v160_v7 = vpop.permute.xlu0 %159 }
  0x88   : > { %v166_v8 = vpop.permute.xlu1 %165  ;;  %v162_v9 = vpop.permute.xlu0 %161 }
  0x89   : > { %v169_v10 = vsel %vm167_vm0, %v160_v7, %v162_v9  ;;  %v171_v11 = vsel %vm167_vm0, %v164_v6, %v166_v8  ;;  %v170_v12 = vsel %vm167_vm0, %v162_v9, %v164_v6 }
  0x8a   : > { %896 = vmatprep.subr.msk.mxu0 %vm176_vm1, %v169_v10  ;;  %899 = vmatprep.subr.msk.mxu1 %vm176_vm1, %v171_v11 }
  0x8b   : > { %900 = vmatpush1.msk.msra.mxu1 %vm176_vm1, %v170_v12 }
  0x8c   : > { %v485_v14 = vpop.permute.xlu1 %484  ;;  %901 = vmatmul.mubr.msk.f32.vlgmr.msra.gmra.mrb[0].mxu1 %vm172_vm2, %v895_v13  ;;  %v158_v15 = vpop.permute.xlu0 %157  ;;  %905 = vmatprep.subr.msk.mxu1 %vm176_vm1, %v147_v1 }
  0x8d   : > { %v168_v16 = vsel %vm167_vm0, %v158_v15, %v160_v7  ;;  %906 = vmatpush1.msk.msra.mxu1 %vm176_vm1, %v146_v4  ;;  %473 = vmatprep.mubr.f32.mxu1 %v958_v0 }
  0x8e   : > { %897 = vmatpush1.msk.msra.mxu0 %vm176_vm1, %v168_v16 }
  0x8f   : > { %898 = vmatmul.mubr.msk.f32.vlgmr.msra.gmra.mrb[0].mxu0 %vm172_vm2, %v895_v13  ;;  %902 = vmatprep.subr.msk.mxu0 %vm176_vm1, %v145_v2 }
  0x90   : > { %v489_v17 = vpop.permute.xlu1 %488  ;;  %v487_v18 = vpop.permute.xlu0 %486  ;;  %903 = vmatpush1.msk.msra.mxu0 %vm176_vm1, %v144_v5  ;;  %402 = vmatprep.mubr.f32.mxu0 %v958_v0 }
  0x91   : > { %v494_v19 = vsel %vm492_vm3, %v485_v14, %v487_v18  ;;  %v495_v21 = vsel %vm492_vm3, %v487_v18, %v489_v17 }
  0x92   : > { %909 = vmatprep.subr.msk.mxu0 %vm176_vm1, %v494_v19 }
  0x94   : > { %907 = vmatmul.mubr.msk.f32.vlgmr.msra.gmra.mrb[0].mxu1 %vm172_vm2, %v149_v20  ;;  %v483_v22 = vpop.permute.xlu1 %482  ;;  %v491_v23 = vpop.permute.xlu0 %490 }
  0x95   : > { %v493_v24 = vsel %vm492_vm3, %v483_v22, %v485_v14  ;;  %v496_v25 = vsel %vm492_vm3, %v489_v17, %v491_v23  ;;  %643 = vmatprep.mubr.f32.mxu1 %v958_v0 }
  0x96   : > { %912 = vmatprep.subr.msk.mxu1 %vm176_vm1, %v496_v25 }
  0x97   : > { %904 = vmatmul.mubr.msk.f32.vlgmr.msra.gmra.mrb[0].mxu0 %vm172_vm2, %v149_v20  ;;  %913 = vmatpush1.msk.msra.mxu1 %vm176_vm1, %v495_v21 }
  0x98   : > { %910 = vmatpush1.msk.msra.mxu0 %vm176_vm1, %v493_v24  ;;  %v661_v26 = vpop.permute.xlu1 %660  ;;  %v659_v27 = vpop.permute.xlu0 %658  ;;  %572 = vmatprep.mubr.f32.mxu0 %v958_v0 }
  0x99   : > { %v668_v28 = vsel %vm666_vm4, %v659_v27, %v661_v26 }
  0x9a   : > { %916 = vmatprep.subr.msk.mxu0 %vm176_vm1, %v668_v28 }
  0x9c   : > { %v665_v30 = vpop.permute.xlu1 %664  ;;  %914 = vmatmul.mubr.msk.f32.vlgmr.msra.gmra.mrb[0].mxu1 %vm172_vm2, %v908_v29  ;;  %v663_v31 = vpop.permute.xlu0 %662 }
  0x9d   : > { %v669_v32 = vsel %vm666_vm4, %v661_v26, %v663_v31  ;;  %v670_v33 = vsel %vm666_vm4, %v663_v31, %v665_v30  ;;  %817 = vmatprep.mubr.f32.mxu1 %v958_v0 }
  0x9e   : > { %919 = vmatprep.subr.msk.mxu1 %vm176_vm1, %v670_v33 }
  0x9f   : > { %911 = vmatmul.mubr.msk.f32.vlgmr.msra.gmra.mrb[0].mxu0 %vm172_vm2, %v908_v29  ;;  %920 = vmatpush1.msk.msra.mxu1 %vm176_vm1, %v669_v32 }
  0xa0   : > { %v657_v34 = vpop.permute.xlu0 %656  ;;  %746 = vmatprep.mubr.f32.mxu0 %v958_v0 }
  0xa1   : > { %v667_v35 = vsel %vm666_vm4, %v657_v34, %v659_v27 }
  0xa2   : > { %917 = vmatpush1.msk.msra.mxu0 %vm176_vm1, %v667_v35 }
  0xa4   : > { %921 = vmatmul.mubr.msk.f32.vlgmr.msra.gmra.mrb[0].mxu1 %vm172_vm2, %v915_v36 }
  0xa7   : > { %918 = vmatmul.mubr.msk.f32.vlgmr.msra.gmra.mrb[0].mxu0 %vm172_vm2, %v915_v36 }
 0x177   : > { %v819_v37 = vpop.f32.mrb[0].mxu1 }
 0x178   : > { %830 = vst [vmem:[%s143_s29 + $0x10] sm:$0x1f] %v819_v37  ;;  %v821_v38 = vpop.f32.mrb[1].mxu1 }
 0x179   : > { %831 = vst [vmem:[%s143_s29 + $0x18] sm:$0x1f] %v821_v38 }
 0x17a   : > { %v748_v39 = vpop.f32.mrb[0].mxu0 }
 0x17b   : > { %828 = vst [vmem:[%s143_s29] sm:$0x1f] %v748_v39  ;;  %v750_v40 = vpop.f32.mrb[1].mxu0 }
 0x17c   : > { %829 = vst [vmem:[%s143_s29 + $0x8] sm:$0x1f] %v750_v40 }
 0x17d PF: > { %s12_s9 = sadd.s32 1, %s956_s9  }
 0x17e   : > { %p9_p4 = scmp.ge.s32.totalorder %s12_s9, 4  }
 0x180   :  { %11 = sbr.rel (!%p9_p4) target bundleno = 1 (0x1), region = 61 }

</bundles_post_ra>
